<compile_context>
chip_gen: v7x
topology: tpu7x:2x2x1
jax: 0.10.0
libtpu: 0.0.40
codegen_flags: <defaults>
</compile_context>

<pallas_src>
import jax
import jax.numpy as jnp
import numpy as np
from jax.experimental import pallas as pl
from jax.experimental.pallas import tpu as pltpu

KH = KW = 3      # conv kernel size (stride=1, pad=1)
POOL = 2         # maxpool window & stride
_SUBLANES = 8    # f32 sublane tile height
_LANES = 128     # lane width


def _round_up(x, m):
    return (x + m - 1) // m * m


def _tap_shifts_and_masks(H, W):
    """Lane-roll shift and 0/1 in-image mask for each of the 9 conv taps."""
    HW = H * W
    hh, ww = np.divmod(np.arange(HW), W)
    shifts = []
    masks = np.zeros((KH * KW, HW), np.float32)
    t = 0
    for dh in (-1, 0, 1):
        for dw in (-1, 0, 1):
            shifts.append((-(dh * W + dw)) % HW)
            masks[t] = ((hh + dh >= 0) & (hh + dh < H) &
                        (ww + dw >= 0) & (ww + dw < W))
            t += 1
    return tuple(shifts), masks


def _pool_selection(H, W, out_w):
    """(HW, out_w) 0/1 matrix: column j (< Ho*Wo) picks raster index
    (2*(j//Wo))*W + 2*(j%Wo) (the top-left corner of pool window j, which is
    where the roll-based 2x2 window max lives); padding columns are zero."""
    Ho, Wo = H // POOL, W // POOL
    sel = np.zeros((H * W, out_w), np.float32)
    j = np.arange(Ho * Wo)
    src = (POOL * (j // Wo)) * W + POOL * (j % Wo)
    sel[src, j] = 1.0
    return sel


def _const_spec(shape):
    """BlockSpec for an operand whose block index never changes: single-buffer
    it (halves its VMEM footprint); fall back to default if the running JAX
    does not expose pipeline_mode/Buffered."""
    index_map = lambda i: (0,) * len(shape)
    try:
        return pl.BlockSpec(shape, index_map, pipeline_mode=pl.Buffered(1))
    except (AttributeError, TypeError):
        return pl.BlockSpec(shape, index_map)


def _make_kernel(H, W, Cin, shifts, compute_dtype):
    """conv(3x3, pad=1) + ReLU + maxpool(2,2) kernel body (one image/step)."""
    HW = H * W
    n_taps = KH * KW
    center = n_taps // 2          # (dh, dw) == (0, 0): no roll, no mask

    def kernel(x_ref, w_ref, b_ref, m_ref, s_ref, o_ref):
        # x_ref: (1, Cin, HW)      lane-dense flat image   (compute dtype)
        # w_ref: (Cout, 9*Cin)     im2col weights          (compute dtype)
        # b_ref: (Cout, 1)         bias                    (f32)
        # m_ref: (9, HW)           0/1 boundary masks      (compute dtype)
        # s_ref: (HW, HoWo_pad)    0/1 pool-selection      (compute dtype)
        # o_ref: (1, Cout, HoWo_pad)
        x = x_ref[0]                                        # (Cin, HW)

        # In-kernel zero padding: each 3x3 tap is a lane roll (XLU) of the
        # flat image times its boundary mask (VPU multiply, exact 0/1).
        taps = []
        for t in range(n_taps):
            tap = pltpu.roll(x, shifts[t], axis=1) if shifts[t] else x
            if t != center:
                tap = tap * m_ref[t:t + 1, :]
            taps.append(tap)
        patches = jnp.concatenate(taps, axis=0)             # (9*Cin, HW)

        # ONE fused conv matmul, f32 accumulation on the MXU.  Default matmul
        # precision is kept (use precision=HIGHEST here for bit-parity with a
        # strict f32 backbone if required).
        acc = jnp.dot(w_ref[...], patches,
                      preferred_element_type=jnp.float32)   # (Cout, HW)

        # MaxPool2d(2,2) in raster order: two lane rolls + elementwise max.
        # Selected positions (even h, even w) never read across the image
        # wrap, so no masking is needed.
        hmax = jnp.maximum(acc, pltpu.roll(acc, HW - 1, axis=1))   # x[m+1]
        vmax = jnp.maximum(hmax, pltpu.roll(hmax, HW - W, axis=1)) # x[m+W]

        # Compact the even-(h,w) lanes with a small 0/1 selection matmul
        # (Cout x HW x HoWo_pad FLOPs; v1's permutation was 9*Cpad x HW x HW).
        pooled = jnp.dot(vmax.astype(compute_dtype), s_ref[...],
                         preferred_element_type=jnp.float32)  # (Cout, HoWo_pad)

        # bias + ReLU commute with the window max (same bias everywhere,
        # ReLU monotone), so apply them once at pooled resolution.
        out = jnp.maximum(pooled + b_ref[...], 0.0)
        o_ref[0] = out.astype(o_ref.dtype)

    return kernel


def features_forward(x_nchw, w_oihw, b, *, compute_dtype=jnp.bfloat16):
    """Frozen conv(3x3, pad=1) -> ReLU -> MaxPool2d(2, 2); NCHW in / NCHW out."""
    # mirror of PyTorch `freeze`: parameters are constants w.r.t. autodiff
    w_oihw = jax.lax.stop_gradient(w_oihw)
    b = jax.lax.stop_gradient(b)

    N, Cin, H, W = x_nchw.shape
    Cout = w_oihw.shape[0]
    assert H % POOL == 0 and W % POOL == 0, "MaxPool2d(2,2) expects even H, W"
    Ho, Wo = H // POOL, W // POOL
    HW, HoWo = H * W, Ho * Wo
    HoWo_pad = _round_up(HoWo, _LANES)     # full-lane, unmasked output stores
    K = KH * KW * Cin                      # contiguous taps, no zero rows

    # Lane-dense activation layout: pure metadata reshape of NCHW; bf16 cast
    # halves the per-step HBM->VMEM DMA bytes.
    x_flat = x_nchw.reshape(N, Cin, HW).astype(compute_dtype)

    # im2col weights: (Cout, KH, KW, Cin) -> (Cout, 9*Cin) in (tap, channel)
    # order, matching the concatenate order in the kernel.  Tiny, one-time.
    w2d = jnp.transpose(w_oihw, (0, 2, 3, 1)).reshape(Cout, K)
    w2d = w2d.astype(compute_dtype)
    b2 = b.reshape(Cout, 1).astype(jnp.float32)

    shifts, masks_np = _tap_shifts_and_masks(H, W)
    masks = jnp.asarray(masks_np, compute_dtype)
    sel = jnp.asarray(_pool_selection(H, W, HoWo_pad), compute_dtype)

    # Explicit VMEM budget: x block (x2 buffers) + single-buffered constants
    # + out block (x2) + im2col / f32 temporaries, with ~30% headroom.
    cb = jnp.dtype(compute_dtype).itemsize
    ob = jnp.dtype(x_nchw.dtype).itemsize
    vmem_est = int(1.3 * (2 * Cin * HW * cb            # x block, double-buffered
                          + Cout * K * cb              # weights
                          + Cout * 4                   # bias
                          + KH * KW * HW * cb          # masks
                          + HW * HoWo_pad * cb         # selection matrix
                          + 2 * Cout * HoWo_pad * ob   # out block, double-buffered
                          + K * HW * cb                # im2col temporary
                          + 4 * Cout * HW * 4))        # f32 acc / roll / max temps
    compiler_kwargs = dict(dimension_semantics=("parallel",))
    if vmem_est > 32 * 1024 * 1024:
        # TODO(synk): once this approaches v7x's 64 MiB, tile H rows with a
        #             1-row halo instead of just raising the scoped limit.
        compiler_kwargs["vmem_limit_bytes"] = min(vmem_est, 64 * 1024 * 1024)

    out = pl.pallas_call(
        _make_kernel(H, W, Cin, shifts, compute_dtype),
        out_shape=jax.ShapeDtypeStruct((N, Cout, HoWo_pad), x_nchw.dtype),
        grid_spec=pltpu.PrefetchScalarGridSpec(
            num_scalar_prefetch=0,
            grid=(N,),                     # one image per step; both v7x TCs busy
            in_specs=[
                pl.BlockSpec((1, Cin, HW), lambda i: (i, 0, 0)),
                _const_spec((Cout, K)),
                _const_spec((Cout, 1)),
                _const_spec((KH * KW, HW)),
                _const_spec((HW, HoWo_pad)),
            ],
            out_specs=pl.BlockSpec((1, Cout, HoWo_pad), lambda i: (i, 0, 0)),
        ),
        compiler_params=pltpu.CompilerParams(**compiler_kwargs),
    )(x_flat, w2d, b2, masks, sel)

    # Drop the lane padding and restore NCHW (cheap XLA slice + free reshape).
    return out[:, :, :HoWo].reshape(N, Cout, Ho, Wo)


if __name__ == "__main__":
    N, Cin, H, W, Cout = 2, 4, 16, 16, 8

    key = jax.random.PRNGKey(0)
    kx, kw, kb = jax.random.split(key, 3)
    x = jax.random.normal(kx, (N, Cin, H, W), jnp.float32)
    w = jax.random.normal(kw, (Cout, Cin, KH, KW), jnp.float32) * 0.1
    b = jax.random.normal(kb, (Cout,), jnp.float32) * 0.1

    # Pure-JAX reference (conv -> bias -> relu -> maxpool2x2) for validation.
    ref = jax.lax.conv_general_dilated(
        x, w, window_strides=(1, 1), padding=((1, 1), (1, 1)),
        dimension_numbers=("NCHW", "OIHW", "NCHW"))
    ref = jax.nn.relu(ref + b[None, :, None, None])
    ref = jax.lax.reduce_window(ref, -jnp.inf, jax.lax.max,
                                (1, 1, POOL, POOL), (1, 1, POOL, POOL),
                                "VALID")

    # f32 compute path: tight check against the XLA reference.
    out_f32 = jax.block_until_ready(
        features_forward(x, w, b, compute_dtype=jnp.float32))
    np.testing.assert_allclose(np.asarray(out_f32), np.asarray(ref),
                               rtol=1e-5, atol=1e-5)

    # bf16 compute path (default performance configuration): loose check.
    out_bf16 = jax.block_until_ready(features_forward(x, w, b))
    np.testing.assert_allclose(np.asarray(out_bf16), np.asarray(ref),
                               rtol=3e-2, atol=3e-2)

    assert out_f32.shape == (N, Cout, H // POOL, W // POOL)
    assert out_bf16.shape == (N, Cout, H // POOL, W // POOL)
    print("KERNEL_OK")
</pallas_src>

<mosaic_0001>
module attributes {stable_mosaic.version = 11 : i64} {
  func.func @kernel(%arg0: i32, %arg1: memref<1x4x256xf32, #tpu.memory_space<vmem>>, %arg2: memref<8x36xf32, #tpu.memory_space<vmem>>, %arg3: memref<8x1xf32, #tpu.memory_space<vmem>>, %arg4: memref<9x256xf32, #tpu.memory_space<vmem>>, %arg5: memref<256x128xf32, #tpu.memory_space<vmem>>, %arg6: memref<1x8x128xf32, #tpu.memory_space<vmem>>) attributes {dimension_semantics = [#tpu.dimension_semantics<parallel>], iteration_bounds = array<i64: 2>, scalar_prefetch = 0 : i64, scratch_operands = 0 : i64, tpu.core_type = #tpu.core_type<tc>, window_params = [{transform_indices = @transform_0, window_bounds = array<i64: 1, 4, 256>}, {pipeline_mode = #tpu.pipeline_mode<synchronous>, transform_indices = @transform_1, window_bounds = array<i64: 8, 36>}, {pipeline_mode = #tpu.pipeline_mode<synchronous>, transform_indices = @transform_2, window_bounds = array<i64: 8, 1>}, {pipeline_mode = #tpu.pipeline_mode<synchronous>, transform_indices = @transform_3, window_bounds = array<i64: 9, 256>}, {pipeline_mode = #tpu.pipeline_mode<synchronous>, transform_indices = @transform_4, window_bounds = array<i64: 256, 128>}, {transform_indices = @transform_5, window_bounds = array<i64: 1, 8, 128>}]} {
    %c0 = arith.constant 0 : index
    %c0_0 = arith.constant 0 : index
    %c0_1 = arith.constant 0 : index
    %0 = vector.load %arg1[%c0, %c0_0, %c0_1] : memref<1x4x256xf32, #tpu.memory_space<vmem>>, vector<1x4x256xf32>
    %1 = vector.shape_cast %0 : vector<1x4x256xf32> to vector<4x256xf32>
    %c17_i32 = arith.constant 17 : i32
    %2 = tpu.dynamic_rotate %1 by %c17_i32 dim 1 : vector<4x256xf32>, i32 -> vector<4x256xf32>
    %c0_2 = arith.constant 0 : index
    %c0_3 = arith.constant 0 : index
    %3 = vector.load %arg4[%c0_2, %c0_3] : memref<9x256xf32, #tpu.memory_space<vmem>>, vector<1x256xf32>
    %4 = vector.broadcast %3 : vector<1x256xf32> to vector<4x256xf32>
    %5 = arith.mulf %2, %4 : vector<4x256xf32>
    %c16_i32 = arith.constant 16 : i32
    %6 = tpu.dynamic_rotate %1 by %c16_i32 dim 1 : vector<4x256xf32>, i32 -> vector<4x256xf32>
    %c1 = arith.constant 1 : index
    %c0_4 = arith.constant 0 : index
    %7 = vector.load %arg4[%c1, %c0_4] : memref<9x256xf32, #tpu.memory_space<vmem>>, vector<1x256xf32>
    %8 = vector.broadcast %7 : vector<1x256xf32> to vector<4x256xf32>
    %9 = arith.mulf %6, %8 : vector<4x256xf32>
    %c15_i32 = arith.constant 15 : i32
    %10 = tpu.dynamic_rotate %1 by %c15_i32 dim 1 : vector<4x256xf32>, i32 -> vector<4x256xf32>
    %c2 = arith.constant 2 : index
    %c0_5 = arith.constant 0 : index
    %11 = vector.load %arg4[%c2, %c0_5] : memref<9x256xf32, #tpu.memory_space<vmem>>, vector<1x256xf32>
    %12 = vector.broadcast %11 : vector<1x256xf32> to vector<4x256xf32>
    %13 = arith.mulf %10, %12 : vector<4x256xf32>
    %c1_i32 = arith.constant 1 : i32
    %14 = tpu.dynamic_rotate %1 by %c1_i32 dim 1 : vector<4x256xf32>, i32 -> vector<4x256xf32>
    %c3 = arith.constant 3 : index
    %c0_6 = arith.constant 0 : index
    %15 = vector.load %arg4[%c3, %c0_6] : memref<9x256xf32, #tpu.memory_space<vmem>>, vector<1x256xf32>
    %16 = vector.broadcast %15 : vector<1x256xf32> to vector<4x256xf32>
    %17 = arith.mulf %14, %16 : vector<4x256xf32>
    %c255_i32 = arith.constant 255 : i32
    %18 = tpu.dynamic_rotate %1 by %c255_i32 dim 1 : vector<4x256xf32>, i32 -> vector<4x256xf32>
    %c5 = arith.constant 5 : index
    %c0_7 = arith.constant 0 : index
    %19 = vector.load %arg4[%c5, %c0_7] : memref<9x256xf32, #tpu.memory_space<vmem>>, vector<1x256xf32>
    %20 = vector.broadcast %19 : vector<1x256xf32> to vector<4x256xf32>
    %21 = arith.mulf %18, %20 : vector<4x256xf32>
    %c241_i32 = arith.constant 241 : i32
    %22 = tpu.dynamic_rotate %1 by %c241_i32 dim 1 : vector<4x256xf32>, i32 -> vector<4x256xf32>
    %c6 = arith.constant 6 : index
    %c0_8 = arith.constant 0 : index
    %23 = vector.load %arg4[%c6, %c0_8] : memref<9x256xf32, #tpu.memory_space<vmem>>, vector<1x256xf32>
    %24 = vector.broadcast %23 : vector<1x256xf32> to vector<4x256xf32>
    %25 = arith.mulf %22, %24 : vector<4x256xf32>
    %c240_i32 = arith.constant 240 : i32
    %26 = tpu.dynamic_rotate %1 by %c240_i32 dim 1 : vector<4x256xf32>, i32 -> vector<4x256xf32>
    %c7 = arith.constant 7 : index
    %c0_9 = arith.constant 0 : index
    %27 = vector.load %arg4[%c7, %c0_9] : memref<9x256xf32, #tpu.memory_space<vmem>>, vector<1x256xf32>
    %28 = vector.broadcast %27 : vector<1x256xf32> to vector<4x256xf32>
    %29 = arith.mulf %26, %28 : vector<4x256xf32>
    %c239_i32 = arith.constant 239 : i32
    %30 = tpu.dynamic_rotate %1 by %c239_i32 dim 1 : vector<4x256xf32>, i32 -> vector<4x256xf32>
    %c8 = arith.constant 8 : index
    %c0_10 = arith.constant 0 : index
    %31 = vector.load %arg4[%c8, %c0_10] : memref<9x256xf32, #tpu.memory_space<vmem>>, vector<1x256xf32>
    %32 = vector.broadcast %31 : vector<1x256xf32> to vector<4x256xf32>
    %33 = arith.mulf %30, %32 : vector<4x256xf32>
    %34 = tpu.concatenate %5, %9, %13, %17, %1, %21, %25, %29, %33 in 0 : vector<4x256xf32>, vector<4x256xf32>, vector<4x256xf32>, vector<4x256xf32>, vector<4x256xf32>, vector<4x256xf32>, vector<4x256xf32>, vector<4x256xf32>, vector<4x256xf32> -> vector<36x256xf32>
    %c0_11 = arith.constant 0 : index
    %c0_12 = arith.constant 0 : index
    %35 = vector.load %arg2[%c0_11, %c0_12] : memref<8x36xf32, #tpu.memory_space<vmem>>, vector<8x36xf32>
    %cst = arith.constant dense<0.000000e+00> : vector<8x256xf32>
    %36 = tpu.matmul %35, %34, %cst {dimension_numbers = #tpu.dot_dimension_numbers<[1], [0], [0], [1], [0, 0, 1, 1], [], []>} : vector<8x36xf32>, vector<36x256xf32>, vector<8x256xf32> -> vector<8x256xf32>
    %c255_i32_13 = arith.constant 255 : i32
    %37 = tpu.dynamic_rotate %36 by %c255_i32_13 dim 1 : vector<8x256xf32>, i32 -> vector<8x256xf32>
    %38 = arith.maximumf %36, %37 : vector<8x256xf32>
    %c240_i32_14 = arith.constant 240 : i32
    %39 = tpu.dynamic_rotate %38 by %c240_i32_14 dim 1 : vector<8x256xf32>, i32 -> vector<8x256xf32>
    %40 = arith.maximumf %38, %39 : vector<8x256xf32>
    %c0_15 = arith.constant 0 : index
    %c0_16 = arith.constant 0 : index
    %41 = vector.load %arg5[%c0_15, %c0_16] : memref<256x128xf32, #tpu.memory_space<vmem>>, vector<256x128xf32>
    %cst_17 = arith.constant dense<0.000000e+00> : vector<8x128xf32>
    %42 = tpu.matmul %40, %41, %cst_17 {dimension_numbers = #tpu.dot_dimension_numbers<[1], [0], [0], [1], [0, 0, 1, 1], [], []>} : vector<8x256xf32>, vector<256x128xf32>, vector<8x128xf32> -> vector<8x128xf32>
    %c0_18 = arith.constant 0 : index
    %c0_19 = arith.constant 0 : index
    %43 = vector.load %arg3[%c0_18, %c0_19] : memref<8x1xf32, #tpu.memory_space<vmem>>, vector<8x1xf32>
    %44 = vector.broadcast %43 : vector<8x1xf32> to vector<8x128xf32>
    %45 = arith.addf %42, %44 : vector<8x128xf32>
    %cst_20 = arith.constant 0.000000e+00 : f32
    %46 = vector.broadcast %cst_20 : f32 to vector<8x128xf32>
    %47 = arith.maximumf %45, %46 : vector<8x128xf32>
    %c0_21 = arith.constant 0 : index
    %c0_22 = arith.constant 0 : index
    %c0_23 = arith.constant 0 : index
    %48 = vector.load %arg6[%c0_21, %c0_22, %c0_23] : memref<1x8x128xf32, #tpu.memory_space<vmem>>, vector<1x8x128xf32>
    %49 = vector.shape_cast %48 : vector<1x8x128xf32> to vector<8x128xf32>
    %50 = vector.shape_cast %47 : vector<8x128xf32> to vector<1x8x128xf32>
    tpu.vector_store %arg6[%c0_21, %c0_22, %c0_23], %50 {strides = array<i32>} : memref<1x8x128xf32, #tpu.memory_space<vmem>>, vector<1x8x128xf32>,
    return
  }
  func.func @transform_0(%arg0: i32) -> (i32, i32, i32) {
    %c0_i32 = arith.constant 0 : i32
    %c0_i32_0 = arith.constant 0 : i32
    %c0_i32_1 = arith.constant 0 : i32
    return %arg0, %c0_i32, %c0_i32_0 : i32, i32, i32
  }
  func.func @transform_1(%arg0: i32) -> (i32, i32) {
    %c0_i32 = arith.constant 0 : i32
    %c0_i32_0 = arith.constant 0 : i32
    %c0_i32_1 = arith.constant 0 : i32
    return %c0_i32, %c0_i32_0 : i32, i32
  }
  func.func @transform_2(%arg0: i32) -> (i32, i32) {
    %c0_i32 = arith.constant 0 : i32
    %c0_i32_0 = arith.constant 0 : i32
    %c0_i32_1 = arith.constant 0 : i32
    return %c0_i32, %c0_i32_0 : i32, i32
  }
  func.func @transform_3(%arg0: i32) -> (i32, i32) {
    %c0_i32 = arith.constant 0 : i32
    %c0_i32_0 = arith.constant 0 : i32
    %c0_i32_1 = arith.constant 0 : i32
    return %c0_i32, %c0_i32_0 : i32, i32
  }
  func.func @transform_4(%arg0: i32) -> (i32, i32) {
    %c0_i32 = arith.constant 0 : i32
    %c0_i32_0 = arith.constant 0 : i32
    %c0_i32_1 = arith.constant 0 : i32
    return %c0_i32, %c0_i32_0 : i32, i32
  }
  func.func @transform_5(%arg0: i32) -> (i32, i32, i32) {
    %c0_i32 = arith.constant 0 : i32
    %c0_i32_0 = arith.constant 0 : i32
    %c0_i32_1 = arith.constant 0 : i32
    return %arg0, %c0_i32, %c0_i32_0 : i32, i32, i32
  }
}

</mosaic_0001>

<bundles_post_ra>
// kernel: tpu_custom_call.1
= control target key start
LH: loop header
LB: loop body
LE: loop exit
PB: predicated region body
PF: predicated region fallthrough
CT: control target
= control target key end

     0   :  { %10 = vsyncpa [#allocation3], 0  ;;  %s1527_s0 = inlined_call_operand.hbm [shape: f32[2,4,256], index: 0, kind: input, shape index: {}]   ;;  %s1528_s1 = inlined_call_operand.vmem [shape: f32[8,36], index: 1, kind: input, shape index: {}]   ;;  %s1529_s2 = inlined_call_operand.vmem [shape: f32[8,1], index: 2, kind: input, shape index: {}]   ;;  %s1530_s3 = inlined_call_operand.hbm [shape: f32[9,256], index: 3, kind: input, shape index: {}]   ;;  %s1531_s4 = inlined_call_operand.hbm [shape: f32[256,128], index: 4, kind: input, shape index: {}]   ;;  %s1532_s5 = inlined_call_operand.hbm [shape: f32[2,8,128], index: 5, kind: output, shape index: {}]  }
   0x1   :  { %12 = vsyncpa [#allocation3 + $0x1], 0 }
   0x2   :  { %13 = vsyncpa [#allocation6], 0 }
   0x3   :  { %14 = vsyncpa [#allocation4], 0 }
   0x4   :  { %16 = vsyncpa [#allocation4 + $0x1], 0  ;;  %s1190_s18 = smov 0   ;;  %s1192_s19 = smov 0  }
   0x5   :  { %s1194_s20 = smov 0   ;;  %s1196_s21 = smov 0  }
   0x6 LB: > { %s1211_s22 = sadd.s32 4294967295, %s1140_s21   ;;  %s795_s23 = sadd.s32 4294967294, %s1140_s21   ;;  %s1140_s21 = sphi %s1196_s21, %s1552_s21   ;;  %s1136_s20 = sphi %s1194_s20, %s1551_s20   ;;  %s1132_s19 = sphi %s1192_s19, %s1550_s19   ;;  %s1128_s18 = sphi %s1190_s18, %s1549_s18  }
   0x7   : > { %p42_p0 = scmp.ne.s32.totalorder %s1132_s19, %s1128_s18  ;;  %p1533_p1 = scmp.eq.s32.totalorder %s1211_s22, 0 }
   0x8   : > { %p156_p3 = scmp.eq.s32.totalorder %s795_s23, 1  ;;  %p796_p5 = scmp.ge.s32.totalorder %s1140_s21, 1 }
   0x9   : > { %p1220_p4 = por %p1533_p1, %p42_p0  ;;  %p163_p7 = scmp.lt.s32.totalorder %s1140_s21, 3 }
   0xa   : > { %p1225_p6 = por %p156_p3, %p42_p0  ;;  %s1142_s27 = smov [#allocation5]  }
   0xb   : > { %s1536_s24 = scalar_select %p1220_p4, 1, 0 }
   0xc   : > { %s1537_s25 = scalar_select %p1225_p6, 1, 0 }
   0xd   : > { %p1230_p8 = pnand %p796_p5, %p163_p7  ;;  %s181_s28 = sshll.u32 %s1142_s27, 4  ;;  %s1234_s28 = int_to_ptr.vmem [resolvable:$true] %s181_s28 }
   0xe   : > { %s1143_s30 = smov [#allocation7]   ;;  %s984_s9 = scalar_lea.hbm %s1530_s3, 512 }
   0xf   : > { %p903_p9 = pneg %p1230_p8  ;;  %s194_s6 = sshll.u32 %s1143_s30, 4  ;;  %s1245_s6 = int_to_ptr.vmem [resolvable:$true] %s194_s6 }
  0x10   : > { %p985_p12 = scmp.ne.s32.totalorder %s1530_s3, %s984_s9  ;;  %p991_p5 = scmp.lt.u32.totalorder %s984_s9, %s1530_s3 }
  0x11   : > { %p1241_p11 = pnand %p903_p9, %p1533_p1 }
  0x13   : > { %p986_p13 = pneg %p1241_p11 }
  0x15   : > { %p987_p0 = pnand %p986_p13, %p985_p12 }
  0x17   : > { %p988_p3 = pneg %p987_p0 }
  0x19   : > { %p993_p7 = pnand %p991_p5, %p988_p3 }
  0x1b   : > { %996 = shalt.err (!%p993_p7)
}
  0x1c   : > { %s997_s14 = scalar_lea.vmem %s1234_s28, 512  ;;  %p1005_p2 = scmp.lt.s32.totalorder %s1234_s28, %s1234_s28 }
  0x1d   : > { %p998_p9 = scmp.ne.s32.totalorder %s1234_s28, %s997_s14  ;;  %p1006_p12 = scmp.lt.s32.totalorder %s997_s14, %s997_s14 }
  0x1f   : > { %p1000_p10 = pnand %p998_p9, %p986_p13  ;;  %p1007_p0 = por %p1006_p12, %p1005_p2 }
  0x21   : > { %p1001_p1 = pneg %p1000_p10 }
  0x23   : > { %p1008_p6 = pnand %p1007_p0, %p1001_p1 }
  0x25   : > { %1011 = shalt.err (!%p1008_p6)
}
  0x26   : > { %s1144_s15 = smov 256   ;;  %s1145_s16 = smov 16  }
  0x27   : > { %906 = dma.hbm_to_vmem [thread:$0]  (!%p1241_p11), %s1530_s3, 512, %s1234_s28, [#allocation6], %s1144_s15, %s1144_s15, %s1145_s16  }
  0x28   : > { %s1012_s7 = scalar_lea.hbm %s1531_s4, 4096 }
  0x29   : > { %p1013_p2 = scmp.ne.s32.totalorder %s1531_s4, %s1012_s7  ;;  %p1019_p10 = scmp.lt.u32.totalorder %s1012_s7, %s1531_s4 }
  0x2b   : > { %p1015_p1 = pnand %p1013_p2, %p986_p13 }
  0x2d   : > { %p1016_p6 = pneg %p1015_p1 }
  0x2f   : > { %p1021_p3 = pnand %p1019_p10, %p1016_p6 }
  0x31   : > { %1024 = shalt.err (!%p1021_p3)
}
  0x32   : > { %s1025_s28 = scalar_lea.vmem %s1245_s6, 4096  ;;  %p1033_p12 = scmp.lt.s32.totalorder %s1245_s6, %s1245_s6 }
  0x33   : > { %p1026_p5 = scmp.ne.s32.totalorder %s1245_s6, %s1025_s28  ;;  %p1034_p0 = scmp.lt.s32.totalorder %s1025_s28, %s1025_s28 }
  0x35   : > { %p1028_p7 = pnand %p1026_p5, %p986_p13  ;;  %p1035_p2 = por %p1034_p0, %p1033_p12 }
  0x37   : > { %p1029_p9 = pneg %p1028_p7 }
  0x39   : > { %p1036_p1 = pnand %p1035_p2, %p1029_p9 }
  0x3b   : > { %1039 = shalt.err (!%p1036_p1)
}
  0x3c   : > { %s1146_s12 = smov 128   ;;  %s1147_s13 = smov 8  }
  0x3d   : > { %909 = dma.hbm_to_vmem [thread:$0]  (!%p1241_p11), %s1531_s4, 4096, %s1245_s6, [#allocation6], %s1146_s12, %s1146_s12, %s1147_s13  }
  0x3e   : > { %s1300_s16 = sadd.s32 1, %s1140_s21   ;;  %s29_s23 = sadd.s32 1, %s1136_s20 }
  0x3f   : > { %s26_s17 = ssub.s32 %s1140_s21, %s1300_s16  ;;  %p36_p6 = scmp.ne.s32.totalorder %s1136_s20, %s1132_s19 }
  0x40   : > { %p27_p13 = scmp.eq.s32.totalorder %s26_s17, 0  ;;  %p37_p10 = scmp.eq.s32.totalorder %s1140_s21, 0 }
  0x41   : > { %p1540_p5 = scmp.eq.s32.totalorder %s1211_s22, 1  ;;  %p920_p9 = scmp.lt.s32.totalorder %s1140_s21, 2 }
  0x42   : > { %s1309_s27 = scalar_select %p27_p13, %s1136_s20, %s29_s23  }
  0x43   : > { %p38_p3 = por %p37_p10, %p36_p6  ;;  %p1313_p7 = por %p1540_p5, %p36_p6 }
  0x44   : > { %s208_s29 = sand.u32 1, %s1136_s20   ;;  %s815_s6 = sshll.u32 %s1140_s21, 7 }
  0x45   : > { %s1541_s30 = scalar_select %p1313_p7, 1, 0 }
  0x46   : > { %s800_s7 = sshll.u32 %s208_s29, 3  ;;  %s1323_s10 = scalar_lea.hbm %s1527_s0, %s815_s6 }
  0x47   : > { %s212_s11 = scalar_lea.vmem [#allocation2], %s800_s7  ;;  %p1327_p11 = pnand %p920_p9, %p38_p3 }
  0x48   : > { %s220_s28 = sshll.u32 %s212_s11, 4  ;;  %s209_s13 = scalar_lea.sflag [#allocation3], %s208_s29  ;;  %s1325_s28 = int_to_ptr.vmem [resolvable:$true] %s220_s28 }
  0x49   : > { %s1040_s14 = scalar_lea.hbm %s1323_s10, 128  ;;  %p1042_p0 = pneg %p1327_p11 }
  0x4a   : > { %p1041_p12 = scmp.ne.s32.totalorder %s1323_s10, %s1040_s14  ;;  %s1045_s23 = scalar_lea.hbm %s1527_s0, 256 }
  0x4b   : > { %p1046_p13 = scmp.lt.u32.totalorder %s1323_s10, %s1527_s0  ;;  %p1047_p6 = scmp.lt.u32.totalorder %s1045_s23, %s1040_s14 }
  0x4c   : > { %p1043_p2 = pnand %p1042_p0, %p1041_p12  ;;  %p1049_p3 = scmp.lt.u32.totalorder %s1040_s14, %s1323_s10 }
  0x4d   : > { %p1048_p10 = por %p1047_p6, %p1046_p13 }
  0x4e   : > { %p1044_p1 = pneg %p1043_p2 }
  0x4f   : > { %p1050_p5 = por %p1049_p3, %p1048_p10 }
  0x51   : > { %p1051_p9 = pnand %p1050_p5, %p1044_p1 }
  0x53   : > { %1054 = shalt.err (!%p1051_p9)
}
  0x54   : > { %s1055_s29 = scalar_lea.vmem %s1325_s28, 128  ;;  %s1148_s8 = smov [#allocation2]  }
  0x55   : > { %p1056_p12 = scmp.ne.s32.totalorder %s1325_s28, %s1055_s29  ;;  %s1060_s9 = sshll.u32 %s1148_s8, 4  ;;  %s1061_s9 = int_to_ptr.vmem [resolvable:$false] %s1060_s9 }
  0x56   : > { %s1062_s11 = scalar_lea.vmem %s1061_s9, 256  ;;  %p1063_p4 = scmp.lt.s32.totalorder %s1325_s28, %s1061_s9 }
  0x57   : > { %p1058_p2 = pnand %p1056_p12, %p1042_p0  ;;  %p1064_p13 = scmp.lt.s32.totalorder %s1062_s11, %s1055_s29 }
  0x59   : > { %p1059_p7 = pneg %p1058_p2  ;;  %p1065_p6 = por %p1064_p13, %p1063_p4 }
  0x5b   : > { %p1066_p10 = pnand %p1065_p6, %p1059_p7 }
  0x5d   : > { %1069 = shalt.err (!%p1066_p10)
}
  0x5e   : > { %913 = dma.hbm_to_vmem [thread:$0]  (!%p1327_p11), %s1323_s10, 128, %s1325_s28, %s209_s13  }
  0x5f   : > { %229 = sbr.rel (%p1230_p8) target bundleno = 949 (0x3b5), region = 40  ;;  %s1359_s14 = sand.u32 (!%p1230_p8), 1, %s1132_s19  }
  0x60   : > { %s804_s15 = sshll.u32 (!%p1230_p8), %s1359_s14, 3  ;;  %s232_s17 = scalar_lea.sflag (!%p1230_p8), [#allocation3], %s1359_s14 }
  0x61   : > { %s235_s23 = scalar_lea.vmem (!%p1230_p8), [#allocation2], %s804_s15  ;;  %p1543_p4 = scmp.ne.s32.totalorder (!%p1230_p8), %s1536_s24, 0 }
  0x66   : > { %1115 = dma.done.wait (%p1543_p4), %s232_s17, 128  }
  0x67   : > { %1117 = vsyncadd (%p1543_p4), %s232_s17, 4294967168  ;;  %p1544_p7 = scmp.eq.s32.totalorder %s1211_s22, 0 }
  0x69   : > { %1119 = dma.done.wait (%p1544_p7), [#allocation6], 4608   ;;  %p1545_p8 = pmov %p1544_p7 }
  0x6a   : > { %v1373_v0 = vld [vmem:[%s235_s23] sm:$0xff]  ;;  %s1149_s26 = smov 1   ;;  %s1150_s10 = smov 16   ;;  %v1155_v2 = vmov 0.0   ;;  %v278_v3 = vlaneseq  ;;  %vm475_vm4 = vcmask 1043456   ;;  %vm485_vm9 = vcmask 293888  }
  0x6b   : > { %1121 = vsyncadd (%p1545_p8), [#allocation6], 4294962688  ;;  %341 = vrot.lane.b32.xlu1 %v1373_v0, %s1149_s26  ;;  %297 = vrot.lane.b32.xlu0 %v1373_v0, %s1150_s10  ;;  %v1379_v1 = vcombine.high %v1373_v0, %v1373_v0  ;;  %s1151_s24 = smov 17   ;;  %s1152_s28 = smov 15  }
  0x6c   : > { %s1153_s12 = smov 127   ;;  %s1154_s13 = smov 112   ;;  %559 = vmatprep.mubr.f32.mxu0 %v1155_v2  ;;  %v286_v4 = vshrl.u32 %v278_v3, 7  ;;  %v1399_v5 = vand.u32 127, %v278_v3 }
  0x6d   : > { %s1156_s7 = smov 113   ;;  %s1157_s6 = smov 111   ;;  %v349_v10 = vld [vmem:[#allocation5 + $0x3] ss:$8 sm:$0x3] }
  0x6e   : > { %v1401_v8 = vsub.s32 0, %v286_v4  ;;  %v1403_v9 = vsub.s32 1, %v286_v4  ;;  %vm345_vm0 = vcmp.lt.s32.totalorder %v1399_v5, 1  ;;  %v305_v11 = vld [vmem:[#allocation5 + $0x1] ss:$8 sm:$0x3] }
  0x6f   : > { %274 = vrot.lane.b32.xlu0 %v1373_v0, %s1151_s24  ;;  %343 = vrot.lane.b32.xlu1 %v1379_v1, %s1149_s26  ;;  %v283_v16 = vld [vmem:[#allocation5] ss:$8 sm:$0x3]  ;;  %vm301_vm1 = vcmp.lt.s32.totalorder %v1399_v5, 16  ;;  %vm280_vm2 = vcmp.lt.s32.totalorder %v1399_v5, 17  ;;  %vm323_vm3 = vcmp.lt.s32.totalorder %v1399_v5, 15 }
  0x70   : > { %v354_v14 = vrot.slane %v349_v10, %v1401_v8  ;;  %v358_v15 = vrot.slane %v349_v10, %v1403_v9  ;;  %v310_v19 = vrot.slane %v305_v11, %v1401_v8  ;;  %v314_v20 = vrot.slane %v305_v11, %v1403_v9  ;;  %v327_v21 = vld [vmem:[#allocation5 + $0x2] ss:$8 sm:$0x3]  ;;  %v371_v40 = vld [vmem:[#allocation5 + $0x5] ss:$8 sm:$0x3] }
  0x71   : > { %v288_v22 = vrot.slane %v283_v16, %v1401_v8  ;;  %v292_v23 = vrot.slane %v283_v16, %v1403_v9  ;;  %v332_v32 = vrot.slane %v327_v21, %v1401_v8  ;;  %v336_v33 = vrot.slane %v327_v21, %v1403_v9  ;;  %v415_v51 = vld [vmem:[#allocation5 + $0x7] ss:$8 sm:$0x3]  ;;  %v393_v2 = vld [vmem:[#allocation5 + $0x6] ss:$8 sm:$0x3] }
  0x72   : > { %vm367_vm5 = vcmp.lt.s32.totalorder %v1399_v5, 127  ;;  %v376_v49 = vrot.slane %v371_v40, %v1401_v8  ;;  %v380_v50 = vrot.slane %v371_v40, %v1403_v9  ;;  %vm411_vm6 = vcmp.lt.s32.totalorder %v1399_v5, 112  ;;  %v437_v16 = vld [vmem:[#allocation5 + $0x10] ss:$8 sm:$0x3]  ;;  %v582_v40 = vld [vmem:[#allocation7] sm:$0xff] }
  0x73   : > { %276 = vrot.lane.b32.xlu1 %v1379_v1, %s1151_s24  ;;  %299 = vrot.lane.b32.xlu0 %v1379_v1, %s1150_s10  ;;  %v420_v62 = vrot.slane %v415_v51, %v1401_v8  ;;  %v424_v63 = vrot.slane %v415_v51, %v1403_v9  ;;  %vm389_vm7 = vcmp.lt.s32.totalorder %v1399_v5, 113  ;;  %vm433_vm8 = vcmp.lt.s32.totalorder %v1399_v5, 111  ;;  %s812_s17 = sshll.u32 %s1211_s22, 7  ;;  %s269_s23 = scalar_lea.vmem [#allocation8], %s804_s15 }
  0x74   : > { %s706_s26 = sshll.u32 %s269_s23, 4  ;;  %p1546_p0 = scmp.ne.s32.totalorder %s1541_s30, 0  ;;  %s1485_s26 = int_to_ptr.vmem [resolvable:$true] %s706_s26 }
  0x75   : > { %s1159_s22 = smov [#allocation8]  }
  0x76   : > { %s1074_s15 = sshll.u32 %s1159_s22, 4  ;;  %s1075_s15 = int_to_ptr.vmem [resolvable:$false] %s1074_s15 }
  0x77   : > { %321 = vrot.lane.b32.xlu1 %v1379_v1, %s1152_s28  ;;  %319 = vrot.lane.b32.xlu0 %v1373_v0, %s1152_s28  ;;  %s1483_s28 = scalar_lea.hbm %s1532_s5, %s812_s17  ;;  %p1077_p5 = scmp.lt.s32.totalorder %s1485_s26, %s1075_s15 }
  0x7b   : > { %365 = vrot.lane.b32.xlu1 %v1379_v1, %s1153_s12  ;;  %363 = vrot.lane.b32.xlu0 %v1373_v0, %s1153_s12 }
  0x7f   : > { %409 = vrot.lane.b32.xlu1 %v1379_v1, %s1154_s13  ;;  %407 = vrot.lane.b32.xlu0 %v1373_v0, %s1154_s13 }
  0x83   : > { %387 = vrot.lane.b32.xlu1 %v1379_v1, %s1156_s7  ;;  %385 = vrot.lane.b32.xlu0 %v1373_v0, %s1156_s7  ;;  %s1076_s7 = scalar_lea.vmem %s1075_s15, 256 }
  0x87   : > { %431 = vrot.lane.b32.xlu1 %v1379_v1, %s1157_s6  ;;  %429 = vrot.lane.b32.xlu0 %v1373_v0, %s1157_s6 }
  0xdd   : > { %v342_v6 = vpop.permute.xlu1 %341  ;;  %v298_v7 = vpop.permute.xlu0 %297 }
  0xe1   : > { %v275_v12 = vpop.permute.xlu0 %274  ;;  %v344_v13 = vpop.permute.xlu1 %343 }
  0xe2   : > { %v346_v17 = vsel %vm345_vm0, %v342_v6, %v344_v13  ;;  %v347_v18 = vsel %vm345_vm0, %v344_v13, %v342_v6 }
  0xe3   : > { %v361_v26 = vmul.f32 %v354_v14, %v347_v18  ;;  %v362_v27 = vmul.f32 %v358_v15, %v346_v17  ;;  %v398_v14 = vrot.slane %v393_v2, %v1401_v8  ;;  %v402_v15 = vrot.slane %v393_v2, %v1403_v9  ;;  %v606_v2 = vld [vmem:[#allocation7 + $0xc0] sm:$0xff] }
  0xe5   : > { %v277_v24 = vpop.permute.xlu1 %276  ;;  %v300_v25 = vpop.permute.xlu0 %299  ;;  %v459_v41 = vrot.slane %v361_v26, 4  ;;  %v460_v42 = vrot.slane %v362_v27, 4 }
  0xe6   : > { %v302_v28 = vsel %vm301_vm1, %v298_v7, %v300_v25  ;;  %v303_v29 = vsel %vm301_vm1, %v300_v25, %v298_v7  ;;  %v281_v34 = vsel %vm280_vm2, %v275_v12, %v277_v24  ;;  %v282_v35 = vsel %vm280_vm2, %v277_v24, %v275_v12 }
  0xe7   : > { %v317_v30 = vmul.f32 %v310_v19, %v303_v29  ;;  %v318_v31 = vmul.f32 %v314_v20, %v302_v28  ;;  %v295_v45 = vmul.f32 %v288_v22, %v282_v35  ;;  %v296_v46 = vmul.f32 %v292_v23, %v281_v34 }
  0xe8   : > { %v446_v23 = vrot.slane %v437_v16, %v1403_v9  ;;  %v442_v28 = vrot.slane %v437_v16, %v1401_v8  ;;  %v599_v8 = vld [vmem:[#allocation7 + $0x88] sm:$0xff]  ;;  %v593_v16 = vld [vmem:[#allocation7 + $0x58] sm:$0xff] }
  0xe9   : > { %v453_v36 = vrot.slane %v317_v30, 4  ;;  %v454_v37 = vrot.slane %v318_v31, 4  ;;  %v322_v38 = vpop.permute.xlu1 %321  ;;  %v320_v39 = vpop.permute.xlu0 %319 }
  0xea   : > { %v324_v43 = vsel %vm323_vm3, %v320_v39, %v322_v38  ;;  %v325_v44 = vsel %vm323_vm3, %v322_v38, %v320_v39 }
  0xeb   : > { %v339_v47 = vmul.f32 %v332_v32, %v325_v44  ;;  %v340_v48 = vmul.f32 %v336_v33, %v324_v43  ;;  %v477_v54 = vsel %vm475_vm4, %v296_v46, %v454_v37  ;;  %v476_v56 = vsel %vm475_vm4, %v295_v45, %v453_v36  ;;  %v600_v43 = vld [vmem:[#allocation7 + $0x90] sm:$0xff]  ;;  %v601_v44 = vld [vmem:[#allocation7 + $0x98] sm:$0xff] }
  0xed   : > { %v366_v52 = vpop.permute.xlu1 %365  ;;  %v364_v53 = vpop.permute.xlu0 %363  ;;  %v479_v55 = vsel %vm475_vm4, %v340_v48, %v460_v42  ;;  %v478_v57 = vsel %vm475_vm4, %v339_v47, %v459_v41  ;;  %v583_v42 = vld [vmem:[#allocation7 + $0x8] sm:$0xff]  ;;  %v863_v47 = vpack.c.bf16 %v601_v44, %v600_v43  ;;  %v584_v48 = vld [vmem:[#allocation7 + $0x10] sm:$0xff] }
  0xee   : > { %v368_v58 = vsel %vm367_vm5, %v364_v53, %v366_v52  ;;  %v369_v59 = vsel %vm367_vm5, %v366_v52, %v364_v53  ;;  %v851_v60 = vpack.c.bf16 %v479_v55, %v477_v54  ;;  %v853_v61 = vpack.c.bf16 %v478_v57, %v476_v56  ;;  %v603_v52 = vld [vmem:[#allocation7 + $0xa8] sm:$0xff]  ;;  %v586_v56 = vld [vmem:[#allocation7 + $0x20] sm:$0xff] }
  0xef   : > { %v383_v3 = vmul.f32 %v376_v49, %v368_v58  ;;  %v384_v4 = vmul.f32 %v380_v50, %v369_v59  ;;  %v861_v46 = vpack.c.bf16 %v583_v42, %v582_v40  ;;  %v585_v49 = vld [vmem:[#allocation7 + $0x18] sm:$0xff]  ;;  %v602_v50 = vld [vmem:[#allocation7 + $0xa0] sm:$0xff]  ;;  %v587_v57 = vld [vmem:[#allocation7 + $0x28] sm:$0xff] }
  0xf0   : > { %852 = vmatprep.subr.bf16.mxu0 %v851_v60  ;;  %v865_v54 = vpack.c.bf16 %v585_v49, %v584_v48  ;;  %v867_v55 = vpack.c.bf16 %v603_v52, %v602_v50  ;;  %v604_v58 = vld [vmem:[#allocation7 + $0xb0] sm:$0xff]  ;;  %v605_v59 = vld [vmem:[#allocation7 + $0xb8] sm:$0xff]  ;;  %v869_v60 = vpack.c.bf16 %v587_v57, %v586_v56 }
  0xf1   : > { %v410_v6 = vpop.permute.xlu1 %409  ;;  %854 = vmatpush1.bf16.msra.mxu0 %v853_v61  ;;  %v408_v7 = vpop.permute.xlu0 %407  ;;  %v465_v17 = vrot.slane %v383_v3, 4  ;;  %v466_v18 = vrot.slane %v384_v4, 4  ;;  %v871_v61 = vpack.c.bf16 %v605_v59, %v604_v58  ;;  %v607_v3 = vld [vmem:[#allocation7 + $0xc8] sm:$0xff] }
  0xf2   : > { %v412_v10 = vsel %vm411_vm6, %v408_v7, %v410_v6  ;;  %v413_v11 = vsel %vm411_vm6, %v410_v6, %v408_v7  ;;  %v875_v6 = vpack.c.bf16 %v607_v3, %v606_v2  ;;  %v590_v7 = vld [vmem:[#allocation7 + $0x40] sm:$0xff] }
  0xf3   : > { %v427_v12 = vmul.f32 %v420_v62, %v412_v10  ;;  %v428_v13 = vmul.f32 %v424_v63, %v413_v11  ;;  %v481_v30 = vsel %vm475_vm4, %v1379_v1, %v466_v18  ;;  %v480_v33 = vsel %vm475_vm4, %v1373_v0, %v465_v17  ;;  %v484_v1 = vld [vmem:[%s1528_s1] sm:$0xff]  ;;  %v598_v0 = vld [vmem:[#allocation7 + $0x80] sm:$0xff]  ;;  %v589_v63 = vld [vmem:[#allocation7 + $0x38] sm:$0xff] }
  0xf4   : > { %v859_v41 = vpack.c.bf16 %v599_v8, %v598_v0  ;;  %v588_v62 = vld [vmem:[#allocation7 + $0x30] sm:$0xff]  ;;  %v591_v10 = vld [vmem:[#allocation7 + $0x48] sm:$0xff]  ;;  %v610_v17 = vld [vmem:[#allocation7 + $0xe0] sm:$0xff] }
  0xf5   : > { %v388_v19 = vpop.permute.xlu1 %387  ;;  %v386_v20 = vpop.permute.xlu0 %385  ;;  %v471_v24 = vrot.slane %v427_v12, 4  ;;  %v472_v25 = vrot.slane %v428_v13, 4  ;;  %v873_v4 = vpack.c.bf16 %v589_v63, %v588_v62  ;;  %v608_v11 = vld [vmem:[#allocation7 + $0xd0] sm:$0xff]  ;;  %v609_v12 = vld [vmem:[#allocation7 + $0xd8] sm:$0xff]  ;;  %v877_v13 = vpack.c.bf16 %v591_v10, %v590_v7  ;;  %v611_v18 = vld [vmem:[#allocation7 + $0xe8] sm:$0xff] }
  0xf6   : > { %v390_v21 = vsel %vm389_vm7, %v386_v20, %v388_v19  ;;  %v391_v22 = vsel %vm389_vm7, %v388_v19, %v386_v20  ;;  %860 = vmatprep.subr.bf16.mxu1 %v859_v41  ;;  %v883_v20 = vpack.c.bf16 %v611_v18, %v610_v17 }
  0xf7   : > { %v405_v26 = vmul.f32 %v398_v14, %v390_v21  ;;  %v406_v27 = vmul.f32 %v402_v15, %v391_v22  ;;  %862 = vmatpush3.bf16.msra.mxu1 %v861_v46  ;;  %v879_v14 = vpack.c.bf16 %v609_v12, %v608_v11  ;;  %v592_v15 = vld [vmem:[#allocation7 + $0x50] sm:$0xff]  ;;  %v594_v21 = vld [vmem:[#allocation7 + $0x60] sm:$0xff]  ;;  %v595_v22 = vld [vmem:[#allocation7 + $0x68] sm:$0xff] }
  0xf8   : > { %864 = vmatprep.subr.bf16.mxu1 %v863_v47  ;;  %v881_v19 = vpack.c.bf16 %v593_v16, %v592_v15 }
  0xf9   : > { %v432_v29 = vpop.permute.xlu1 %431  ;;  %v483_v31 = vsel %vm475_vm4, %v406_v27, %v472_v25  ;;  %v430_v32 = vpop.permute.xlu0 %429  ;;  %v482_v34 = vsel %vm475_vm4, %v405_v26, %v471_v24  ;;  %v612_v24 = vld [vmem:[#allocation7 + $0xf0] sm:$0xff]  ;;  %v613_v25 = vld [vmem:[#allocation7 + $0xf8] sm:$0xff] }
  0xfa   : > { %v855_v35 = vpack.c.bf16 %v483_v31, %v481_v30  ;;  %v434_v9 = vsel %vm433_vm8, %v430_v32, %v432_v29  ;;  %v435_v36 = vsel %vm433_vm8, %v432_v29, %v430_v32  ;;  %v857_v37 = vpack.c.bf16 %v482_v34, %v480_v33  ;;  %v596_v27 = vld [vmem:[#allocation7 + $0x70] sm:$0xff] }
  0xfb   : > { %v450_v38 = vmul.f32 %v446_v23, %v435_v36  ;;  %v449_v39 = vmul.f32 %v442_v28, %v434_v9  ;;  %866 = vmatpush3.bf16.msra.mxu1 %v865_v54  ;;  %v885_v23 = vpack.c.bf16 %v595_v22, %v594_v21  ;;  %v887_v26 = vpack.c.bf16 %v613_v25, %v612_v24  ;;  %v597_v28 = vld [vmem:[#allocation7 + $0x78] sm:$0xff]  ;;  %v614_v33 = vld [vmem:[%s1529_s2] sm:$0xff] }
  0xfc   : > { %856 = vmatprep.subr.bf16.mxu0 %v855_v35  ;;  %868 = vmatprep.subr.bf16.mxu1 %v867_v55  ;;  %v889_v29 = vpack.c.bf16 %v597_v28, %v596_v27  ;;  %v1158_v34 = vmov 0  }
  0xfd   : > { %858 = vmatpush1.bf16.msra.mxu0 %v857_v37  ;;  %982 = vset.pattern.permute.xlu0 %v1158_v34 }
  0xfe   : > { %808 = vmatprep.subr.msk.mxu0 %vm475_vm4, %v450_v38 }
  0xff   : > { %870 = vmatpush3.bf16.msra.mxu1 %v869_v60 }
 0x100   : > { %872 = vmatprep.subr.bf16.mxu1 %v871_v61 }
 0x101   : > { %809 = vmatpush1.msk.msra.mxu0 %vm475_vm4, %v449_v39 }
 0x102   : > { %810 = vmatmul.mubr.msk.f32.vlgmr.msra.gmra.mrb[0].mxu0 %vm485_vm9, %v484_v1 }
 0x103   : > { %874 = vmatpush3.bf16.msra.mxu1 %v873_v4 }
 0x104   : > { %876 = vmatprep.subr.bf16.mxu1 %v875_v6 }
 0x107   : > { %878 = vmatpush3.bf16.msra.mxu1 %v877_v13 }
 0x108   : > { %880 = vmatprep.subr.bf16.mxu1 %v879_v14 }
 0x10b   : > { %882 = vmatpush3.bf16.msra.mxu1 %v881_v19 }
 0x10c   : > { %884 = vmatprep.subr.bf16.mxu1 %v883_v20 }
 0x10f   : > { %886 = vmatpush3.bf16.msra.mxu1 %v885_v23 }
 0x110   : > { %888 = vmatprep.subr.bf16.mxu1 %v887_v26 }
 0x113   : > { %890 = vmatpush3.bf16.msra.mxu1 %v889_v29 }
 0x1d5   : > { %v1456_v45 = vpop.f32.mrb[0].mxu0 }
 0x1d6   : > { %v1458_v51 = vpop.f32.mrb[1].mxu0 }
 0x1d7   : > { %v972_v53 = vpack.i.bf16 %v1458_v51, %v1456_v45 }
 0x1d9   : > { %973 = vrot.lane.b32.xlu0 %v972_v53, %s1153_s12  ;;  %s693_s12 = scalar_lea.sflag [#allocation4], %s1359_s14 }
 0x1dd   : > { %617 = vperm.xlu0 %982, %v614_v33  }
 0x24b   : > { %v974_v30 = vpop.permute.xlu0 %973 }
 0x24c   : > { %v976_v31 = vunpack.i.h.bf16 %v974_v30  ;;  %v975_v32 = vunpack.i.l.bf16 %v974_v30 }
 0x24e   : > { %v570_v35 = vsel %vm367_vm5, %v975_v32, %v976_v31  ;;  %v571_v9 = vsel %vm367_vm5, %v976_v31, %v975_v32 }
 0x24f   : > { %v572_v36 = vmax.f32 %v1456_v45, %v570_v35  ;;  %v573_v37 = vmax.f32 %v1458_v51, %v571_v9 }
 0x251   : > { %v977_v38 = vpack.i.bf16 %v573_v37, %v572_v36 }
 0x253   : > { %978 = vrot.lane.b32.xlu1 %v977_v38, %s1154_s13  ;;  %s1070_s13 = scalar_lea.vmem %s1485_s26, 128 }
 0x254   : > { %p1071_p11 = scmp.ne.s32.totalorder %s1485_s26, %s1070_s13  ;;  %p1078_p9 = scmp.lt.s32.totalorder %s1076_s7, %s1070_s13 }
 0x256   : > { %p1072_p1 = pnand %p1071_p11, %p1546_p0  ;;  %p1079_p12 = por %p1078_p9, %p1077_p5 }
 0x258   : > { %p1073_p3 = pneg %p1072_p1 }
 0x25a   : > { %p1080_p2 = pnand %p1079_p12, %p1073_p3 }
 0x25c   : > { %v618_v45 = vpop.permute.xlu0 %617 }
 0x2c5   : > { %v979_v39 = vpop.permute.xlu1 %978 }
 0x2c6   : > { %v981_v1 = vunpack.i.h.bf16 %v979_v39  ;;  %v980_v0 = vunpack.i.l.bf16 %v979_v39 }
 0x2c8   : > { %v579_v8 = vsel %vm411_vm6, %v981_v1, %v980_v0  ;;  %v578_v40 = vsel %vm411_vm6, %v980_v0, %v981_v1 }
 0x2c9   : > { %v581_v41 = vmax.f32 %v573_v37, %v579_v8  ;;  %v580_v42 = vmax.f32 %v572_v36, %v578_v40 }
 0x2cb   : > { %684 = vmatprep.mubr.f32.mxu1 %v581_v41 }
 0x2cc   : > { %685 = vmatmul.mubr.f32.vlgmr.msra.gmra.mrb[0].mxu1 %v580_v42 }
 0x39f   : > { %v848_v43 = vpop.f32.mrb[0].mxu1 }
 0x3a0   : > { %v849_v44 = vpop.f32.mrb[1].mxu1 }
 0x3a1   : > { %v850_v46 = vadd.f32 %v849_v44, %v848_v43 }
 0x3a3   : > { %v687_v47 = vadd.f32 %v850_v46, %v618_v45 }
 0x3a5   : > { %v690_v48 = vmax.f32 %v687_v47, 0.0 }
 0x3a7   : > { %691 = vst [vmem:[%s269_s23] sm:$0xff] %v690_v48 }
 0x3a8   : > { %1083 = shalt.err (!%p1080_p2)
}
 0x3a9   : > { %s1084_s14 = scalar_lea.hbm %s1483_s28, 128  ;;  %s1088_s8 = scalar_lea.hbm %s1532_s5, 256 }
 0x3aa   : > { %p1085_p13 = scmp.ne.s32.totalorder %s1483_s28, %s1084_s14  ;;  %p1089_p4 = scmp.lt.u32.totalorder %s1483_s28, %s1532_s5 }
 0x3ab   : > { %p1090_p7 = scmp.lt.u32.totalorder %s1088_s8, %s1084_s14  ;;  %p1092_p11 = scmp.lt.u32.totalorder %s1084_s14, %s1483_s28 }
 0x3ac   : > { %p1086_p6 = pnand %p1085_p13, %p1546_p0 }
 0x3ad   : > { %p1091_p8 = por %p1090_p7, %p1089_p4 }
 0x3ae   : > { %p1087_p10 = pneg %p1086_p6 }
 0x3af   : > { %p1093_p1 = por %p1092_p11, %p1091_p8 }
 0x3b1   : > { %p1094_p3 = pnand %p1093_p1, %p1087_p10 }
 0x3b3   : > { %1097 = shalt.err (!%p1094_p3)
}
 0x3b4   : > { %901 = dma.vmem_to_hbm [thread:$0]  (%p1546_p0), %s1485_s26, 128, %s1483_s28, %s693_s12  }
 0x3b5 PF: > { %s718_s17 = sand.u32 1, %s1128_s18   ;;  %p1547_p5 = scmp.ne.s32.totalorder %s1537_s25, 0 }
 0x3b6   : > { %p1548_p9 = scmp.ge.s32.totalorder %s1140_s21, 2  ;;  %s719_s23 = scalar_lea.sflag [#allocation4], %s718_s17 }
 0x3b8   : > { %p915_p12 = pnand %p1548_p9, %p1547_p5 }
 0x3ba   : > { %1123 = dma.done.wait (!%p915_p12), %s719_s23, 128  }
 0x3bb   : > { %1125 = vsyncadd (!%p915_p12), %s719_s23, 4294967168  ;;  %p19_p2 = scmp.ge.s32.totalorder %s1300_s16, 4   ;;  %s1549_s18 = smov %s1132_s19 }
 0x3bc   : > { %s1550_s19 = smov %s1136_s20  ;;  %s1551_s20 = smov %s1309_s27 }
 0x3bd   : > { %s1552_s21 = smov %s1300_s16  ;;  %21 = sbr.rel (!%p19_p2) target bundleno = 6 (0x6), region = 100 }
 0x3c4   :  { %724 = vsyncpa [#allocation3], 1 }
 0x3c5   :  { %726 = vsyncpa [#allocation3 + $0x1], 1 }
 0x3c6   :  { %727 = vsyncpa [#allocation6], 1 }
 0x3c7   :  { %728 = vsyncpa [#allocation4], 1 }
 0x3c8   :  { %730 = vsyncpa [#allocation4 + $0x1], 1 }

</bundles_post_ra>
